<compile_context>
chip_gen: v5e
topology: v5e:2x2
jax: 0.10.0
libtpu: 0.0.40
codegen_flags: <defaults>
</compile_context>

<pallas_src>
import jax
import jax.numpy as jnp
from jax import lax
from jax.experimental import pallas as pl
from jax.experimental.pallas import tpu as pltpu


# ---------------------------------------------------------------------------
# helpers
# ---------------------------------------------------------------------------
def make_divisible(v, divisor=8, min_value=None):
    if min_value is None:
        min_value = divisor
    new_v = max(min_value, int(v + divisor / 2) // divisor * divisor)
    if new_v < 0.9 * v:
        new_v += divisor
    return new_v


def _pick_n_block(N, per_image_bytes, budget_bytes=12 << 20, max_unroll=16):
    """Largest divisor of N within the VMEM budget (and a small static unroll cap)."""
    cap = max(1, min(max_unroll, budget_bytes // max(per_image_bytes, 1)))
    nb = 1
    for d in range(1, N + 1):
        if N % d == 0 and d <= cap:
            nb = d
    return nb


# ---------------------------------------------------------------------------
# fused Pallas kernel (whole block, NB batch elements per grid step)
# ---------------------------------------------------------------------------
def fused_conv_block_nchw(x_nchw, params, *, kernel_size=3, stride=1,
                          n_block=None, strip_seams=True, use_core_parallel=False):
    """FusedConvBlock forward, NCHW in / NCHW out, eval-mode BN folded in `params`."""
    # TODO(synk): stride=2 (no identity shortcut) variant not implemented.
    assert stride == 1, "only the stride==1 FusedConvBlock variant is implemented"
    assert kernel_size % 2 == 1, "only odd kernel sizes supported"

    N, C, H, W = x_nchw.shape
    k = kernel_size
    pad = k // 2
    Wp = W + 2 * pad            # padded width (seam columns kept until the very end)
    Hp = H + 2 * pad
    L = H * Wp                  # flat length of one image's (seam-carrying) output
    C_inner = params["w1"].shape[0]
    C_out = params["w2"].shape[0]
    assert params["w1"].shape[1] == k * k * C
    has_skip = (stride == 1 and C == C_out)

    # flat padded-input length per image: max tap offset + L, rounded to 128 lanes
    need = (k - 1) * Wp + (k - 1) + L
    LP = ((need + 127) // 128) * 128
    t_center = pad * k + pad    # im2col tap whose rows are exactly x (the shortcut)

    # ---- batch blocking: NB images per grid step, concatenated along lanes -----
    per_image_bytes = 4 * (2 * C * LP + k * k * C * L + 2 * C_out * L + 2 * C_inner * L)
    if n_block is None:
        n_block = _pick_n_block(N, per_image_bytes)
    NB = n_block
    assert N % NB == 0, "n_block must divide the batch size"
    G = N // NB
    NL = NB * L

    def kernel(x_ref, w1_ref, b1_ref, w2_ref, b2_ref, out_ref, col_ref):
        # x_ref   : (NB, C, LP)  f32   pre-padded, spatially-flattened images
        # w1_ref  : (C_inner, k*k*C)   bf16, BN1-folded kxk conv weights (im2col layout)
        # b1_ref  : (C_inner, 1)  f32  BN1 bias
        # w2_ref  : (C_out, C_inner)   bf16, BN2-folded 1x1 conv weights
        # b2_ref  : (C_out, 1)    f32  BN2 bias
        # out_ref : (1, C_out, NB*L)   lane-dense output slab (images along lanes)
        # col_ref : (k*k*C, NB*L) f32  im2col scratch; every element rewritten each step

        # ---- im2col: k*k lane-shifted patches per image, images along lanes ------
        for n in range(NB):                       # static unroll (NB kept small)
            xn = x_ref[n]                         # (C, LP)
            for t in range(k * k):
                off = (t // k) * Wp + (t % k)
                col_ref[t * C:(t + 1) * C, n * L:(n + 1) * L] = xn[:, off:off + L]

        patches = col_ref[...]                    # (k*k*C, NL) f32

        # ---- kxk conv (BN folded): ONE bf16 MXU matmul, K = k*k*C, f32 acc -------
        inner = jnp.dot(w1_ref[...], patches.astype(jnp.bfloat16),
                        preferred_element_type=jnp.float32)        # (C_inner, NL)
        inner = jnp.maximum(inner + b1_ref[...], 0.0)              # bias + ReLU (f32)

        # ---- 1x1 pointwise conv (BN folded) + bias --------------------------------
        out = jnp.dot(w2_ref[...], inner.astype(jnp.bfloat16),
                      preferred_element_type=jnp.float32) + b2_ref[...]   # (C_out, NL)

        # ---- identity shortcut = center-tap rows of the im2col scratch (f32) ------
        if has_skip:
            out = out + patches[t_center * C:(t_center + 1) * C, :]

        out_ref[0] = out                          # one lane-dense (C_out, NL) store

    # ---- wrapper-side zero pad (one cheap XLA pad; removes all in-kernel padding) -
    xp = jnp.pad(x_nchw, ((0, 0), (0, 0), (pad, pad), (pad, pad)))
    xp = xp.reshape(N, C, Hp * Wp)
    xp = jnp.pad(xp, ((0, 0), (0, 0), (0, LP - Hp * Wp)))

    flops = int(2 * N * H * W * (k * k * C * C_inner + C_inner * C_out))
    bytes_accessed = int(4 * (N * C * LP + N * C_out * L + C_inner + C_out)
                         + 2 * (C_inner * k * k * C + C_out * C_inner))

    if use_core_parallel:
        # v7x (2 TensorCores/chip): explicitly shard the batch-block grid axis.
        dims = (pltpu.CORE_PARALLEL,)
    else:
        dims = ("parallel",)    # v5e/v6e single TC; measured ~= "arbitrary"

    out_flat = pl.pallas_call(
        kernel,
        out_shape=jax.ShapeDtypeStruct((G, C_out, NL), jnp.float32),
        grid=(G,),
        in_specs=[
            pl.BlockSpec((NB, C, LP), lambda g: (g, 0, 0)),
            pl.BlockSpec((C_inner, k * k * C), lambda g: (0, 0)),
            pl.BlockSpec((C_inner, 1), lambda g: (0, 0)),
            pl.BlockSpec((C_out, C_inner), lambda g: (0, 0)),
            pl.BlockSpec((C_out, 1), lambda g: (0, 0)),
        ],
        out_specs=pl.BlockSpec((1, C_out, NL), lambda g: (g, 0, 0)),
        scratch_shapes=[pltpu.VMEM((k * k * C, NL), jnp.float32)],
        compiler_params=pltpu.CompilerParams(
            dimension_semantics=dims,
            vmem_limit_bytes=32 * 1024 * 1024,      # explicit; usage is far below this
        ),
        cost_estimate=pl.CostEstimate(flops=flops, transcendentals=0,
                                      bytes_accessed=bytes_accessed),
    )(xp, params["w1"], params["b1"], params["w2"], params["b2"])

    # un-concatenate NB images from the lane dim (tiny wrapper-side copy)
    out = out_flat.reshape(G, C_out, NB, H, Wp)
    out = jnp.transpose(out, (0, 2, 1, 3, 4)).reshape(N, C_out, H, Wp)
    if strip_seams:
        # keep strip_seams=False when chaining blocks in the padded (H, Wp) layout
        # and strip only once at the end of the network.
        out = out[:, :, :, :W]
    return out


# ---------------------------------------------------------------------------
# parameter construction (Conv2d bias=False + eval-mode affine BN) and folding
# ---------------------------------------------------------------------------
def make_conv_bn_params(key, C_in, C_out, k):
    k1, k2, k3, k4, k5 = jax.random.split(key, 5)
    w = 0.1 * jax.random.normal(k1, (k, k, C_in, C_out), jnp.float32)     # HWIO
    gamma = 1.0 + 0.1 * jax.random.normal(k2, (C_out,), jnp.float32)
    beta = 0.1 * jax.random.normal(k3, (C_out,), jnp.float32)
    rmean = 0.1 * jax.random.normal(k4, (C_out,), jnp.float32)
    rvar = jax.random.uniform(k5, (C_out,), jnp.float32, minval=0.5, maxval=1.5)
    return w, gamma, beta, rmean, rvar


def fold_params(raw, eps=1e-5):
    """Fold eval-mode BN into conv weights; lay them out for the kernel.
    Weights -> bf16 (MXU operands); biases stay f32 (VPU epilogue)."""
    w1, g1, be1, rm1, rv1 = raw["conv"]
    w2, g2, be2, rm2, rv2 = raw["pw"]
    k = w1.shape[0]
    C = w1.shape[2]
    C_inner = w1.shape[3]
    C_out = w2.shape[3]
    s1 = g1 / jnp.sqrt(rv1 + eps)
    b1 = be1 - rm1 * s1
    s2 = g2 / jnp.sqrt(rv2 + eps)
    b2 = be2 - rm2 * s2
    # (k,k,C,C_inner) -> (k*k*C, C_inner): row index = tap*C + channel  (im2col order)
    w1f = (w1 * s1).reshape(k * k * C, C_inner)
    w1t = jnp.transpose(w1f, (1, 0)).astype(jnp.bfloat16)                 # (C_inner, k*k*C)
    w2t = jnp.transpose(w2[0, 0] * s2, (1, 0)).astype(jnp.bfloat16)       # (C_out, C_inner)
    return {"w1": w1t, "b1": b1.reshape(C_inner, 1).astype(jnp.float32),
            "w2": w2t, "b2": b2.reshape(C_out, 1).astype(jnp.float32)}


# ---------------------------------------------------------------------------
# pure-JAX reference (f32, for correctness verification)
# ---------------------------------------------------------------------------
def _conv_bn_ref(x_nhwc, w_hwio, gamma, beta, rmean, rvar, pad, eps=1e-5):
    y = lax.conv_general_dilated(
        x_nhwc, w_hwio, window_strides=(1, 1),
        padding=[(pad, pad), (pad, pad)],
        dimension_numbers=("NHWC", "HWIO", "NHWC"))
    s = gamma / jnp.sqrt(rvar + eps)
    return y * s + (beta - rmean * s)


def fused_conv_block_reference_nchw(x_nchw, raw):
    x = jnp.transpose(x_nchw, (0, 2, 3, 1))                           # -> NHWC
    y = jax.nn.relu(_conv_bn_ref(x, *raw["conv"], pad=raw["conv"][0].shape[0] // 2))
    z = _conv_bn_ref(y, *raw["pw"], pad=0)
    z = z + x                                                         # identity shortcut
    return jnp.transpose(z, (0, 3, 1, 2))                             # -> NCHW


# ---------------------------------------------------------------------------
if __name__ == "__main__":
    N, C, H, W = 2, 4, 16, 16
    expansion, C_out, stride, ksz = 6, 4, 1, 3
    C_inner = make_divisible(C * expansion, 8)          # 24

    key = jax.random.PRNGKey(0)
    kx_, kc, kp = jax.random.split(key, 3)
    x_nchw = jax.random.normal(kx_, (N, C, H, W), jnp.float32)

    raw = {
        "conv": make_conv_bn_params(kc, C, C_inner, ksz),   # kxk conv + BN1 (+ReLU)
        "pw": make_conv_bn_params(kp, C_inner, 1 and C_out, 1),  # 1x1 conv + BN2
    }
    params = fold_params(raw)

    out = fused_conv_block_nchw(x_nchw, params, kernel_size=ksz, stride=stride)
    out = jax.block_until_ready(out)

    ref = jax.block_until_ready(fused_conv_block_reference_nchw(x_nchw, raw))
    assert out.shape == (N, C_out, H, W)
    max_err = float(jnp.max(jnp.abs(out - ref)))
    # bf16 MXU operands (per perf review) -> tolerance loosened from 1e-4.
    assert jnp.allclose(out, ref, atol=5e-2, rtol=5e-2), max_err

    print("KERNEL_OK")
</pallas_src>

<mosaic_0001>
module attributes {stable_mosaic.version = 11 : i64} {
  func.func @kernel(%arg0: i32, %arg1: memref<2x4x384xf32, #tpu.memory_space<vmem>>, %arg2: memref<24x36xbf16, #tpu.memory_space<vmem>>, %arg3: memref<24x1xf32, #tpu.memory_space<vmem>>, %arg4: memref<4x24xbf16, #tpu.memory_space<vmem>>, %arg5: memref<4x1xf32, #tpu.memory_space<vmem>>, %arg6: memref<1x4x576xf32, #tpu.memory_space<vmem>>, %arg7: memref<36x576xf32, #tpu.memory_space<vmem>>) attributes {dimension_semantics = [#tpu.dimension_semantics<parallel>], iteration_bounds = array<i64: 1>, scalar_prefetch = 0 : i64, scratch_operands = 1 : i64, tpu.core_type = #tpu.core_type<tc>, window_params = [{transform_indices = @transform_0, window_bounds = array<i64: 2, 4, 384>}, {pipeline_mode = #tpu.pipeline_mode<synchronous>, transform_indices = @transform_1, window_bounds = array<i64: 24, 36>}, {pipeline_mode = #tpu.pipeline_mode<synchronous>, transform_indices = @transform_2, window_bounds = array<i64: 24, 1>}, {pipeline_mode = #tpu.pipeline_mode<synchronous>, transform_indices = @transform_3, window_bounds = array<i64: 4, 24>}, {pipeline_mode = #tpu.pipeline_mode<synchronous>, transform_indices = @transform_4, window_bounds = array<i64: 4, 1>}, {transform_indices = @transform_5, window_bounds = array<i64: 1, 4, 576>}]} {
    %c0 = arith.constant 0 : index
    %c0_0 = arith.constant 0 : index
    %c0_1 = arith.constant 0 : index
    %0 = vector.load %arg1[%c0, %c0_0, %c0_1] : memref<2x4x384xf32, #tpu.memory_space<vmem>>, vector<1x4x384xf32>
    %1 = vector.shape_cast %0 : vector<1x4x384xf32> to vector<4x384xf32>
    %2 = vector.extract_strided_slice %1 {offsets = [0, 0], sizes = [4, 288], strides = [1, 1]} : vector<4x384xf32> to vector<4x288xf32>
    %c0_2 = arith.constant 0 : index
    %c0_3 = arith.constant 0 : index
    %3 = vector.load %arg7[%c0_2, %c0_3] : memref<36x576xf32, #tpu.memory_space<vmem>>, vector<4x288xf32>
    tpu.vector_store %arg7[%c0_2, %c0_3], %2 {strides = array<i32>} : memref<36x576xf32, #tpu.memory_space<vmem>>, vector<4x288xf32>,
    %4 = vector.extract_strided_slice %1 {offsets = [0, 1], sizes = [4, 288], strides = [1, 1]} : vector<4x384xf32> to vector<4x288xf32>
    %c4 = arith.constant 4 : index
    %c0_4 = arith.constant 0 : index
    %5 = vector.load %arg7[%c4, %c0_4] : memref<36x576xf32, #tpu.memory_space<vmem>>, vector<4x288xf32>
    tpu.vector_store %arg7[%c4, %c0_4], %4 {strides = array<i32>} : memref<36x576xf32, #tpu.memory_space<vmem>>, vector<4x288xf32>,
    %6 = vector.extract_strided_slice %1 {offsets = [0, 2], sizes = [4, 288], strides = [1, 1]} : vector<4x384xf32> to vector<4x288xf32>
    %c8 = arith.constant 8 : index
    %c0_5 = arith.constant 0 : index
    %7 = vector.load %arg7[%c8, %c0_5] : memref<36x576xf32, #tpu.memory_space<vmem>>, vector<4x288xf32>
    tpu.vector_store %arg7[%c8, %c0_5], %6 {strides = array<i32>} : memref<36x576xf32, #tpu.memory_space<vmem>>, vector<4x288xf32>,
    %8 = vector.extract_strided_slice %1 {offsets = [0, 18], sizes = [4, 288], strides = [1, 1]} : vector<4x384xf32> to vector<4x288xf32>
    %c12 = arith.constant 12 : index
    %c0_6 = arith.constant 0 : index
    %9 = vector.load %arg7[%c12, %c0_6] : memref<36x576xf32, #tpu.memory_space<vmem>>, vector<4x288xf32>
    tpu.vector_store %arg7[%c12, %c0_6], %8 {strides = array<i32>} : memref<36x576xf32, #tpu.memory_space<vmem>>, vector<4x288xf32>,
    %10 = vector.extract_strided_slice %1 {offsets = [0, 19], sizes = [4, 288], strides = [1, 1]} : vector<4x384xf32> to vector<4x288xf32>
    %c16 = arith.constant 16 : index
    %c0_7 = arith.constant 0 : index
    %11 = vector.load %arg7[%c16, %c0_7] : memref<36x576xf32, #tpu.memory_space<vmem>>, vector<4x288xf32>
    tpu.vector_store %arg7[%c16, %c0_7], %10 {strides = array<i32>} : memref<36x576xf32, #tpu.memory_space<vmem>>, vector<4x288xf32>,
    %12 = vector.extract_strided_slice %1 {offsets = [0, 20], sizes = [4, 288], strides = [1, 1]} : vector<4x384xf32> to vector<4x288xf32>
    %c20 = arith.constant 20 : index
    %c0_8 = arith.constant 0 : index
    %13 = vector.load %arg7[%c20, %c0_8] : memref<36x576xf32, #tpu.memory_space<vmem>>, vector<4x288xf32>
    tpu.vector_store %arg7[%c20, %c0_8], %12 {strides = array<i32>} : memref<36x576xf32, #tpu.memory_space<vmem>>, vector<4x288xf32>,
    %14 = vector.extract_strided_slice %1 {offsets = [0, 36], sizes = [4, 288], strides = [1, 1]} : vector<4x384xf32> to vector<4x288xf32>
    %c24 = arith.constant 24 : index
    %c0_9 = arith.constant 0 : index
    %15 = vector.load %arg7[%c24, %c0_9] : memref<36x576xf32, #tpu.memory_space<vmem>>, vector<4x288xf32>
    tpu.vector_store %arg7[%c24, %c0_9], %14 {strides = array<i32>} : memref<36x576xf32, #tpu.memory_space<vmem>>, vector<4x288xf32>,
    %16 = vector.extract_strided_slice %1 {offsets = [0, 37], sizes = [4, 288], strides = [1, 1]} : vector<4x384xf32> to vector<4x288xf32>
    %c28 = arith.constant 28 : index
    %c0_10 = arith.constant 0 : index
    %17 = vector.load %arg7[%c28, %c0_10] : memref<36x576xf32, #tpu.memory_space<vmem>>, vector<4x288xf32>
    tpu.vector_store %arg7[%c28, %c0_10], %16 {strides = array<i32>} : memref<36x576xf32, #tpu.memory_space<vmem>>, vector<4x288xf32>,
    %18 = vector.extract_strided_slice %1 {offsets = [0, 38], sizes = [4, 288], strides = [1, 1]} : vector<4x384xf32> to vector<4x288xf32>
    %c32 = arith.constant 32 : index
    %c0_11 = arith.constant 0 : index
    %19 = vector.load %arg7[%c32, %c0_11] : memref<36x576xf32, #tpu.memory_space<vmem>>, vector<4x288xf32>
    tpu.vector_store %arg7[%c32, %c0_11], %18 {strides = array<i32>} : memref<36x576xf32, #tpu.memory_space<vmem>>, vector<4x288xf32>,
    %c1 = arith.constant 1 : index
    %c0_12 = arith.constant 0 : index
    %c0_13 = arith.constant 0 : index
    %20 = vector.load %arg1[%c1, %c0_12, %c0_13] : memref<2x4x384xf32, #tpu.memory_space<vmem>>, vector<1x4x384xf32>
    %21 = vector.shape_cast %20 : vector<1x4x384xf32> to vector<4x384xf32>
    %22 = vector.extract_strided_slice %21 {offsets = [0, 0], sizes = [4, 288], strides = [1, 1]} : vector<4x384xf32> to vector<4x288xf32>
    %c0_14 = arith.constant 0 : index
    %c288 = arith.constant 288 : index
    %23 = vector.load %arg7[%c0_14, %c288] : memref<36x576xf32, #tpu.memory_space<vmem>>, vector<4x288xf32>
    tpu.vector_store %arg7[%c0_14, %c288], %22 {strides = array<i32>} : memref<36x576xf32, #tpu.memory_space<vmem>>, vector<4x288xf32>,
    %24 = vector.extract_strided_slice %21 {offsets = [0, 1], sizes = [4, 288], strides = [1, 1]} : vector<4x384xf32> to vector<4x288xf32>
    %c4_15 = arith.constant 4 : index
    %c288_16 = arith.constant 288 : index
    %25 = vector.load %arg7[%c4_15, %c288_16] : memref<36x576xf32, #tpu.memory_space<vmem>>, vector<4x288xf32>
    tpu.vector_store %arg7[%c4_15, %c288_16], %24 {strides = array<i32>} : memref<36x576xf32, #tpu.memory_space<vmem>>, vector<4x288xf32>,
    %26 = vector.extract_strided_slice %21 {offsets = [0, 2], sizes = [4, 288], strides = [1, 1]} : vector<4x384xf32> to vector<4x288xf32>
    %c8_17 = arith.constant 8 : index
    %c288_18 = arith.constant 288 : index
    %27 = vector.load %arg7[%c8_17, %c288_18] : memref<36x576xf32, #tpu.memory_space<vmem>>, vector<4x288xf32>
    tpu.vector_store %arg7[%c8_17, %c288_18], %26 {strides = array<i32>} : memref<36x576xf32, #tpu.memory_space<vmem>>, vector<4x288xf32>,
    %28 = vector.extract_strided_slice %21 {offsets = [0, 18], sizes = [4, 288], strides = [1, 1]} : vector<4x384xf32> to vector<4x288xf32>
    %c12_19 = arith.constant 12 : index
    %c288_20 = arith.constant 288 : index
    %29 = vector.load %arg7[%c12_19, %c288_20] : memref<36x576xf32, #tpu.memory_space<vmem>>, vector<4x288xf32>
    tpu.vector_store %arg7[%c12_19, %c288_20], %28 {strides = array<i32>} : memref<36x576xf32, #tpu.memory_space<vmem>>, vector<4x288xf32>,
    %30 = vector.extract_strided_slice %21 {offsets = [0, 19], sizes = [4, 288], strides = [1, 1]} : vector<4x384xf32> to vector<4x288xf32>
    %c16_21 = arith.constant 16 : index
    %c288_22 = arith.constant 288 : index
    %31 = vector.load %arg7[%c16_21, %c288_22] : memref<36x576xf32, #tpu.memory_space<vmem>>, vector<4x288xf32>
    tpu.vector_store %arg7[%c16_21, %c288_22], %30 {strides = array<i32>} : memref<36x576xf32, #tpu.memory_space<vmem>>, vector<4x288xf32>,
    %32 = vector.extract_strided_slice %21 {offsets = [0, 20], sizes = [4, 288], strides = [1, 1]} : vector<4x384xf32> to vector<4x288xf32>
    %c20_23 = arith.constant 20 : index
    %c288_24 = arith.constant 288 : index
    %33 = vector.load %arg7[%c20_23, %c288_24] : memref<36x576xf32, #tpu.memory_space<vmem>>, vector<4x288xf32>
    tpu.vector_store %arg7[%c20_23, %c288_24], %32 {strides = array<i32>} : memref<36x576xf32, #tpu.memory_space<vmem>>, vector<4x288xf32>,
    %34 = vector.extract_strided_slice %21 {offsets = [0, 36], sizes = [4, 288], strides = [1, 1]} : vector<4x384xf32> to vector<4x288xf32>
    %c24_25 = arith.constant 24 : index
    %c288_26 = arith.constant 288 : index
    %35 = vector.load %arg7[%c24_25, %c288_26] : memref<36x576xf32, #tpu.memory_space<vmem>>, vector<4x288xf32>
    tpu.vector_store %arg7[%c24_25, %c288_26], %34 {strides = array<i32>} : memref<36x576xf32, #tpu.memory_space<vmem>>, vector<4x288xf32>,
    %36 = vector.extract_strided_slice %21 {offsets = [0, 37], sizes = [4, 288], strides = [1, 1]} : vector<4x384xf32> to vector<4x288xf32>
    %c28_27 = arith.constant 28 : index
    %c288_28 = arith.constant 288 : index
    %37 = vector.load %arg7[%c28_27, %c288_28] : memref<36x576xf32, #tpu.memory_space<vmem>>, vector<4x288xf32>
    tpu.vector_store %arg7[%c28_27, %c288_28], %36 {strides = array<i32>} : memref<36x576xf32, #tpu.memory_space<vmem>>, vector<4x288xf32>,
    %38 = vector.extract_strided_slice %21 {offsets = [0, 38], sizes = [4, 288], strides = [1, 1]} : vector<4x384xf32> to vector<4x288xf32>
    %c32_29 = arith.constant 32 : index
    %c288_30 = arith.constant 288 : index
    %39 = vector.load %arg7[%c32_29, %c288_30] : memref<36x576xf32, #tpu.memory_space<vmem>>, vector<4x288xf32>
    tpu.vector_store %arg7[%c32_29, %c288_30], %38 {strides = array<i32>} : memref<36x576xf32, #tpu.memory_space<vmem>>, vector<4x288xf32>,
    %c0_31 = arith.constant 0 : index
    %c0_32 = arith.constant 0 : index
    %40 = vector.load %arg7[%c0_31, %c0_32] : memref<36x576xf32, #tpu.memory_space<vmem>>, vector<36x576xf32>
    %c0_33 = arith.constant 0 : index
    %c0_34 = arith.constant 0 : index
    %41 = vector.load %arg2[%c0_33, %c0_34] : memref<24x36xbf16, #tpu.memory_space<vmem>>, vector<24x36xbf16>
    %42 = arith.truncf %40 : vector<36x576xf32> to vector<36x576xbf16>
    %cst = arith.constant dense<0.000000e+00> : vector<24x576xf32>
    %43 = tpu.matmul %41, %42, %cst {dimension_numbers = #tpu.dot_dimension_numbers<[1], [0], [0], [1], [0, 0, 1, 1], [], []>} : vector<24x36xbf16>, vector<36x576xbf16>, vector<24x576xf32> -> vector<24x576xf32>
    %c0_35 = arith.constant 0 : index
    %c0_36 = arith.constant 0 : index
    %44 = vector.load %arg3[%c0_35, %c0_36] : memref<24x1xf32, #tpu.memory_space<vmem>>, vector<24x1xf32>
    %45 = vector.broadcast %44 : vector<24x1xf32> to vector<24x576xf32>
    %46 = arith.addf %43, %45 : vector<24x576xf32>
    %cst_37 = arith.constant 0.000000e+00 : f32
    %47 = vector.broadcast %cst_37 : f32 to vector<24x576xf32>
    %48 = arith.maximumf %46, %47 : vector<24x576xf32>
    %c0_38 = arith.constant 0 : index
    %c0_39 = arith.constant 0 : index
    %49 = vector.load %arg4[%c0_38, %c0_39] : memref<4x24xbf16, #tpu.memory_space<vmem>>, vector<4x24xbf16>
    %50 = arith.truncf %48 : vector<24x576xf32> to vector<24x576xbf16>
    %cst_40 = arith.constant dense<0.000000e+00> : vector<4x576xf32>
    %51 = tpu.matmul %49, %50, %cst_40 {dimension_numbers = #tpu.dot_dimension_numbers<[1], [0], [0], [1], [0, 0, 1, 1], [], []>} : vector<4x24xbf16>, vector<24x576xbf16>, vector<4x576xf32> -> vector<4x576xf32>
    %c0_41 = arith.constant 0 : index
    %c0_42 = arith.constant 0 : index
    %52 = vector.load %arg5[%c0_41, %c0_42] : memref<4x1xf32, #tpu.memory_space<vmem>>, vector<4x1xf32>
    %53 = vector.broadcast %52 : vector<4x1xf32> to vector<4x576xf32>
    %54 = arith.addf %51, %53 : vector<4x576xf32>
    %55 = vector.extract_strided_slice %40 {offsets = [16, 0], sizes = [4, 576], strides = [1, 1]} : vector<36x576xf32> to vector<4x576xf32>
    %56 = arith.addf %54, %55 : vector<4x576xf32>
    %c0_43 = arith.constant 0 : index
    %c0_44 = arith.constant 0 : index
    %c0_45 = arith.constant 0 : index
    %57 = vector.load %arg6[%c0_43, %c0_44, %c0_45] : memref<1x4x576xf32, #tpu.memory_space<vmem>>, vector<1x4x576xf32>
    %58 = vector.shape_cast %57 : vector<1x4x576xf32> to vector<4x576xf32>
    %59 = vector.shape_cast %56 : vector<4x576xf32> to vector<1x4x576xf32>
    tpu.vector_store %arg6[%c0_43, %c0_44, %c0_45], %59 {strides = array<i32>} : memref<1x4x576xf32, #tpu.memory_space<vmem>>, vector<1x4x576xf32>,
    return
  }
  func.func @transform_0(%arg0: i32) -> (i32, i32, i32) {
    %c0_i32 = arith.constant 0 : i32
    %c0_i32_0 = arith.constant 0 : i32
    %c0_i32_1 = arith.constant 0 : i32
    return %arg0, %c0_i32, %c0_i32_0 : i32, i32, i32
  }
  func.func @transform_1(%arg0: i32) -> (i32, i32) {
    %c0_i32 = arith.constant 0 : i32
    %c0_i32_0 = arith.constant 0 : i32
    %c0_i32_1 = arith.constant 0 : i32
    return %c0_i32, %c0_i32_0 : i32, i32
  }
  func.func @transform_2(%arg0: i32) -> (i32, i32) {
    %c0_i32 = arith.constant 0 : i32
    %c0_i32_0 = arith.constant 0 : i32
    %c0_i32_1 = arith.constant 0 : i32
    return %c0_i32, %c0_i32_0 : i32, i32
  }
  func.func @transform_3(%arg0: i32) -> (i32, i32) {
    %c0_i32 = arith.constant 0 : i32
    %c0_i32_0 = arith.constant 0 : i32
    %c0_i32_1 = arith.constant 0 : i32
    return %c0_i32, %c0_i32_0 : i32, i32
  }
  func.func @transform_4(%arg0: i32) -> (i32, i32) {
    %c0_i32 = arith.constant 0 : i32
    %c0_i32_0 = arith.constant 0 : i32
    %c0_i32_1 = arith.constant 0 : i32
    return %c0_i32, %c0_i32_0 : i32, i32
  }
  func.func @transform_5(%arg0: i32) -> (i32, i32, i32) {
    %c0_i32 = arith.constant 0 : i32
    %c0_i32_0 = arith.constant 0 : i32
    %c0_i32_1 = arith.constant 0 : i32
    return %arg0, %c0_i32, %c0_i32_0 : i32, i32, i32
  }
}

</mosaic_0001>

<bundles_post_ra>
// kernel: tpu_custom_call.1
= control target key start
LH: loop header
LB: loop body
LE: loop exit
PB: predicated region body
PF: predicated region fallthrough
CT: control target
= control target key end

     0   :  { %10 = vsyncpa [#allocation4], 0  ;;  %s1143_s0 = inlined_call_operand.vmem [shape: f32[2,4,384], index: 0, kind: input, shape index: {}]   ;;  %s1144_s1 = inlined_call_operand.hbm [shape: bf16[24,36], index: 1, kind: input, shape index: {}]   ;;  %s1145_s2 = inlined_call_operand.vmem [shape: f32[24,1], index: 2, kind: input, shape index: {}]   ;;  %s1146_s3 = inlined_call_operand.vmem [shape: bf16[4,24], index: 3, kind: input, shape index: {}]   ;;  %s1147_s4 = inlined_call_operand.vmem [shape: f32[4,1], index: 4, kind: input, shape index: {}]   ;;  %s1148_s5 = inlined_call_operand.hbm [shape: f32[1,4,576], index: 5, kind: output, shape index: {}]  }
   0x1   :  { %11 = vsyncpa [#allocation5], 0  ;;  %s18_s20 = sshll.u32 %s1144_s1, 4  ;;  %s863_s21 = smov [#allocation3]   ;;  %s19_s20 = int_to_ptr.hbm [resolvable:$true] %s18_s20 }
   0x2   :  { %s20_s22 = sshll.u32 %s863_s21, 4  ;;  %s864_s23 = smov 64   ;;  %s21_s22 = int_to_ptr.vmem [resolvable:$true] %s20_s22 }
   0x3   :  { %s865_s24 = smov 4  }
   0x4   :  { %26 = dma.hbm_to_vmem [thread:$0]  %s19_s20, 192, %s21_s22, [#allocation4], %s864_s23, %s864_s23, %s865_s24  }
   0x5   :  { %859 = dma.done.wait [#allocation4], 192  }
   0x6   :  { %860 = vsyncadd [#allocation4], 4294967104  ;;  %v921_v0 = vld [vmem:[%s1143_s0] sm:$0xff]  ;;  %v926_v1 = vld [vmem:[%s1143_s0 + $0x8] sm:$0xf]  ;;  %s866_s1 = smov 127  }
   0x7   :  { %42 = vst [vmem:[#allocation1] ss:$2 sm:$0xff] %v921_v0  ;;  %s867_s29 = smov 126   ;;  %s868_s30 = smov 110   ;;  %v951_v26 = vld [vmem:[%s1143_s0 + $0xc] sm:$0xff]  ;;  %vm53_vm0 = vcmask 257024  }
   0x8   :  { %44 = vst [vmem:[#allocation1 + $0x10] ss:$2 sm:$0xff] %v926_v1  ;;  %s869_s6 = smov 109   ;;  %s870_s7 = smov 108   ;;  %v956_v29 = vld [vmem:[%s1143_s0 + $0x14] sm:$0xf] }
   0x9   :  { %s871_s8 = smov 92   ;;  %s872_s9 = smov 91   ;;  %vm68_vm1 = vcmask 1039360   ;;  %vm76_vm2 = vcmask 261124   ;;  %vm90_vm3 = vcmask 1031168   ;;  %vm112_vm4 = vcmask 900096  }
   0xa   :  { %s873_s14 = smov 90   ;;  %s874_s0 = smov 32   ;;  %vm155_vm5 = vcmask 883712   ;;  %vm133_vm6 = vcmask 891904   ;;  %vm176_vm7 = vcmask 752640   ;;  %vm198_vm8 = vcmask 744448  }
   0xb   :  { %s875_s15 = smov 31   ;;  %s876_s16 = smov 30   ;;  %vm251_vm9 = vcmask 1043712   ;;  %vm219_vm10 = vcmask 736256   ;;  %vm245_vm11 = vcmask 261120   ;;  %vm269_vm12 = vcmask 252928  }
   0xc   :  { %s877_s17 = smov 14   ;;  %s878_s18 = smov 13   ;;  %vm275_vm13 = vcmask 1047812   ;;  %vm506_vm14 = vcmask 1041408   ;;  %vm499_vm15 = vcmask 293888  }
   0xd   :  { %s879_s19 = smov 12   ;;  %s880_s20 = smov 124  }
   0xe   :  { %v45_v2 = vld.sshfl [vmem:[#allocation1] sm:$0xff pattern:$0x75316420]  ;;  %v46_v3 = vld.sshfl [vmem:[#allocation1 + $0x8] sm:$0xff pattern:$0x75316420] }
   0xf   :  { %56 = vst [vmem:[#allocation1 + $0x1] ss:$2 sm:$0xff] %v921_v0  ;;  %v931_v4 = vld.sshfl [vmem:[#allocation1 + $0x10] sm:$0xff pattern:$0x75316420]  ;;  %s881_s21 = smov 123  }
  0x10   :  { %51 = vst [vmem:[#allocation2] sm:$0xf] %v45_v2  ;;  %s882_s22 = smov 122  }
  0x11   :  { %52 = vst [vmem:[#allocation2 + $0x8] sm:$0xf] %v46_v3 }
  0x12   :  { %58 = vst [vmem:[#allocation1 + $0x11] ss:$2 sm:$0xff] %v926_v1 }
  0x13   :  { %54 = vst.msk [vmem:[#allocation2 + $0x10] sm:$0xf] %vm53_vm0, %v931_v4 }
  0x16   :  { %v59_v5 = vld.sshfl [vmem:[#allocation1] sm:$0xff pattern:$0x75316420]  ;;  %v60_v6 = vld.sshfl [vmem:[#allocation1 + $0x8] sm:$0xff pattern:$0x75316420] }
  0x17   :  { %62 = vrot.lane.b32.xlu1 %v59_v5, %s866_s1  ;;  %78 = vst [vmem:[#allocation1] ss:$2 sm:$0xff] %v921_v0  ;;  %64 = vrot.lane.b32.xlu2 %v60_v6, %s866_s1 }
  0x19   :  { %v61_v7 = vld.sshfl [vmem:[#allocation1 + $0x10] sm:$0xff pattern:$0x75316420] }
  0x1a   :  { %66 = vrot.lane.b32.xlu0 %v61_v7, %s866_s1  ;;  %80 = vst [vmem:[#allocation1 + $0x10] ss:$2 sm:$0xff] %v926_v1 }
  0x1e   :  { %v82_v8 = vld.sshfl [vmem:[#allocation1 + $0x8] sm:$0xff pattern:$0x75316420]  ;;  %v81_v9 = vld.sshfl [vmem:[#allocation1] sm:$0xff pattern:$0x75316420] }
  0x1f   :  { %86 = vrot.lane.b32.xlu1 %v82_v8, %s867_s29  ;;  %100 = vst [vmem:[#allocation1 + $0x1] ss:$2 sm:$0xff] %v921_v0 }
  0x21   :  { %v83_v10 = vld.sshfl [vmem:[#allocation1 + $0x10] sm:$0xff pattern:$0x75316420] }
  0x22   :  { %84 = vrot.lane.b32.xlu0 %v81_v9, %s867_s29  ;;  %102 = vst [vmem:[#allocation1 + $0x11] ss:$2 sm:$0xff] %v926_v1 }
  0x26   :  { %v104_v11 = vld.sshfl [vmem:[#allocation1 + $0x8] sm:$0xff pattern:$0x75316420]  ;;  %v103_v12 = vld.sshfl [vmem:[#allocation1] sm:$0xff pattern:$0x75316420] }
  0x27   :  { %88 = vrot.lane.b32.xlu1 %v83_v10, %s867_s29  ;;  %106 = vrot.lane.b32.xlu2 %v103_v12, %s868_s30  ;;  %121 = vst [vmem:[#allocation1] ss:$2 sm:$0xff] %v921_v0 }
  0x29   :  { %v105_v13 = vld.sshfl [vmem:[#allocation1 + $0x10] sm:$0xff pattern:$0x75316420] }
  0x2a   :  { %108 = vrot.lane.b32.xlu0 %v104_v11, %s868_s30  ;;  %123 = vst [vmem:[#allocation1 + $0x10] ss:$2 sm:$0xff] %v926_v1 }
  0x2e   :  { %v124_v14 = vld.sshfl [vmem:[#allocation1] sm:$0xff pattern:$0x75316420]  ;;  %v125_v15 = vld.sshfl [vmem:[#allocation1 + $0x8] sm:$0xff pattern:$0x75316420] }
  0x2f   :  { %127 = vrot.lane.b32.xlu1 %v124_v14, %s869_s6  ;;  %110 = vrot.lane.b32.xlu2 %v105_v13, %s868_s30  ;;  %143 = vst [vmem:[#allocation1 + $0x1] ss:$2 sm:$0xff] %v921_v0 }
  0x31   :  { %v126_v16 = vld.sshfl [vmem:[#allocation1 + $0x10] sm:$0xff pattern:$0x75316420] }
  0x32   :  { %145 = vst [vmem:[#allocation1 + $0x11] ss:$2 sm:$0xff] %v926_v1 }
  0x36   :  { %v146_v17 = vld.sshfl [vmem:[#allocation1] sm:$0xff pattern:$0x75316420]  ;;  %v147_v18 = vld.sshfl [vmem:[#allocation1 + $0x8] sm:$0xff pattern:$0x75316420] }
  0x37   :  { %129 = vrot.lane.b32.xlu1 %v125_v15, %s869_s6  ;;  %131 = vrot.lane.b32.xlu2 %v126_v16, %s869_s6  ;;  %164 = vst [vmem:[#allocation1] ss:$2 sm:$0xff] %v921_v0 }
  0x39   :  { %v148_v19 = vld.sshfl [vmem:[#allocation1 + $0x10] sm:$0xff pattern:$0x75316420] }
  0x3a   :  { %153 = vrot.lane.b32.xlu0 %v148_v19, %s870_s7  ;;  %166 = vst [vmem:[#allocation1 + $0x10] ss:$2 sm:$0xff] %v926_v1 }
  0x3e   :  { %v167_v20 = vld.sshfl [vmem:[#allocation1] sm:$0xff pattern:$0x75316420]  ;;  %v168_v21 = vld.sshfl [vmem:[#allocation1 + $0x8] sm:$0xff pattern:$0x75316420] }
  0x3f   :  { %172 = vrot.lane.b32.xlu1 %v168_v21, %s871_s8  ;;  %186 = vst [vmem:[#allocation1 + $0x1] ss:$2 sm:$0xff] %v921_v0  ;;  %149 = vrot.lane.b32.xlu2 %v146_v17, %s870_s7 }
  0x41   :  { %v169_v22 = vld.sshfl [vmem:[#allocation1 + $0x10] sm:$0xff pattern:$0x75316420] }
  0x42   :  { %170 = vrot.lane.b32.xlu0 %v167_v20, %s871_s8  ;;  %188 = vst [vmem:[#allocation1 + $0x11] ss:$2 sm:$0xff] %v926_v1 }
  0x46   :  { %v189_v23 = vld.sshfl [vmem:[#allocation1] sm:$0xff pattern:$0x75316420]  ;;  %v190_v24 = vld.sshfl [vmem:[#allocation1 + $0x8] sm:$0xff pattern:$0x75316420] }
  0x47   :  { %207 = vst [vmem:[#allocation1] ss:$2 sm:$0xff] %v921_v0  ;;  %174 = vrot.lane.b32.xlu1 %v169_v22, %s871_s8  ;;  %151 = vrot.lane.b32.xlu2 %v147_v18, %s870_s7  ;;  %s754_s8 = sshll.u32 %s1148_s5, 4  ;;  %s755_s8 = int_to_ptr.hbm [resolvable:$true] %s754_s8 }
  0x49   :  { %v191_v25 = vld.sshfl [vmem:[#allocation1 + $0x10] sm:$0xff pattern:$0x75316420] }
  0x4a   :  { %194 = vrot.lane.b32.xlu0 %v190_v24, %s872_s9  ;;  %209 = vst [vmem:[#allocation1 + $0x10] ss:$2 sm:$0xff] %v926_v1 }
  0x4e   :  { %v210_v27 = vld.sshfl [vmem:[#allocation1] sm:$0xff pattern:$0x75316420]  ;;  %v211_v28 = vld.sshfl [vmem:[#allocation1 + $0x8] sm:$0xff pattern:$0x75316420] }
  0x4f   :  { %192 = vrot.lane.b32.xlu2 %v189_v23, %s872_s9  ;;  %233 = vst [vmem:[#allocation1] ss:$2 sm:$0xff] %v951_v26 }
  0x51   :  { %v212_v30 = vld.sshfl [vmem:[#allocation1 + $0x10] sm:$0xff pattern:$0x75316420] }
  0x52   :  { %213 = vrot.lane.b32.xlu0 %v210_v27, %s873_s14  ;;  %235 = vst [vmem:[#allocation1 + $0x10] ss:$2 sm:$0xff] %v956_v29  ;;  %217 = vrot.lane.b32.xlu1 %v212_v30, %s873_s14 }
  0x56   :  { %v236_v31 = vld.sshfl [vmem:[#allocation1] sm:$0xff pattern:$0x75316420]  ;;  %v237_v32 = vld.sshfl [vmem:[#allocation1 + $0x8] sm:$0xff pattern:$0x75316420] }
  0x57   :  { %196 = vrot.lane.b32.xlu2 %v191_v25, %s872_s9  ;;  %257 = vst [vmem:[#allocation1 + $0x1] ss:$2 sm:$0xff] %v951_v26 }
  0x59   :  { %v961_v33 = vld.sshfl [vmem:[#allocation1 + $0x10] sm:$0xff pattern:$0x75316420] }
  0x5a   :  { %259 = vst [vmem:[#allocation1 + $0x11] ss:$2 sm:$0xff] %v956_v29  ;;  %215 = vrot.lane.b32.xlu0 %v211_v28, %s873_s14  ;;  %241 = vrot.lane.b32.xlu1 %v237_v32, %s874_s0 }
  0x5e   :  { %v261_v34 = vld.sshfl [vmem:[#allocation1 + $0x8] sm:$0xff pattern:$0x75316420]  ;;  %v260_v35 = vld.sshfl [vmem:[#allocation1] sm:$0xff pattern:$0x75316420] }
  0x5f   :  { %265 = vrot.lane.b32.xlu2 %v261_v34, %s875_s15  ;;  %280 = vst [vmem:[#allocation1] ss:$2 sm:$0xff] %v951_v26 }
  0x61   :  { %v967_v36 = vld.sshfl [vmem:[#allocation1 + $0x10] sm:$0xff pattern:$0x75316420] }
  0x62   :  { %282 = vst [vmem:[#allocation1 + $0x10] ss:$2 sm:$0xff] %v956_v29  ;;  %239 = vrot.lane.b32.xlu0 %v236_v31, %s874_s0  ;;  %263 = vrot.lane.b32.xlu1 %v260_v35, %s875_s15 }
  0x66   :  { %v283_v37 = vld.sshfl [vmem:[#allocation1] sm:$0xff pattern:$0x75316420]  ;;  %v972_v38 = vld.sshfl [vmem:[#allocation1 + $0x8] sm:$0xff pattern:$0x75316420] }
  0x67   :  { %302 = vst [vmem:[#allocation1 + $0x1] ss:$2 sm:$0xff] %v951_v26  ;;  %286 = vrot.lane.b32.xlu2 %v283_v37, %s876_s16 }
  0x69   :  { %v976_v39 = vld.sshfl [vmem:[#allocation1 + $0x10] sm:$0xff pattern:$0x75316420] }
  0x6a   :  { %304 = vst [vmem:[#allocation1 + $0x11] ss:$2 sm:$0xff] %v956_v29 }
  0x6e   :  { %v979_v40 = vld.sshfl [vmem:[#allocation1 + $0x8] sm:$0xff pattern:$0x75316420]  ;;  %v305_v41 = vld.sshfl [vmem:[#allocation1] sm:$0xff pattern:$0x75316420] }
  0x6f   :  { %308 = vrot.lane.b32.xlu0 %v305_v41, %s877_s17  ;;  %323 = vst [vmem:[#allocation1] ss:$2 sm:$0xff] %v951_v26 }
  0x71   :  { %v983_v42 = vld.sshfl [vmem:[#allocation1 + $0x10] sm:$0xff pattern:$0x75316420]  ;;  %v65_v45 = vpop.permute.xlu2 %64 }
  0x72   :  { %325 = vst [vmem:[#allocation1 + $0x10] ss:$2 sm:$0xff] %v956_v29 }
  0x76   :  { %v326_v43 = vld.sshfl [vmem:[#allocation1] sm:$0xff pattern:$0x75316420]  ;;  %v327_v44 = vld.sshfl [vmem:[#allocation1 + $0x8] sm:$0xff pattern:$0x75316420] }
  0x77   :  { %329 = vrot.lane.b32.xlu1 %v326_v43, %s878_s18  ;;  %345 = vst [vmem:[#allocation1 + $0x1] ss:$2 sm:$0xff] %v951_v26 }
  0x79   :  { %v328_v46 = vld.sshfl [vmem:[#allocation1 + $0x10] sm:$0xff pattern:$0x75316420] }
  0x7a   :  { %333 = vrot.lane.b32.xlu2 %v328_v46, %s878_s18  ;;  %347 = vst [vmem:[#allocation1 + $0x11] ss:$2 sm:$0xff] %v956_v29 }
  0x7e   :  { %v348_v47 = vld.sshfl [vmem:[#allocation1] sm:$0xff pattern:$0x75316420]  ;;  %v349_v48 = vld.sshfl [vmem:[#allocation1 + $0x8] sm:$0xff pattern:$0x75316420] }
  0x7f   :  { %331 = vrot.lane.b32.xlu1 %v327_v44, %s878_s18  ;;  %366 = vst [vmem:[#allocation1] ss:$2 sm:$0xff] %v951_v26 }
  0x81   :  { %v350_v49 = vld.sshfl [vmem:[#allocation1 + $0x10] sm:$0xff pattern:$0x75316420]  ;;  %v107_v50 = vpop.permute.xlu2 %106 }
  0x82   :  { %355 = vrot.lane.b32.xlu0 %v350_v49, %s879_s19  ;;  %368 = vst [vmem:[#allocation1 + $0x10] ss:$2 sm:$0xff] %v956_v29  ;;  %351 = vrot.lane.b32.xlu2 %v348_v47, %s879_s19 }
  0x86   :  { %v370_v51 = vld.sshfl [vmem:[#allocation1 + $0x8] sm:$0xff pattern:$0x75316420]  ;;  %v369_v52 = vld.sshfl [vmem:[#allocation1] sm:$0xff pattern:$0x75316420] }
  0x87   :  { %388 = vst [vmem:[#allocation1 + $0x1] ss:$2 sm:$0xff] %v951_v26 }
  0x89   :  { %v63_v53 = vpop.permute.xlu1 %62  ;;  %v371_v54 = vld.sshfl [vmem:[#allocation1 + $0x10] sm:$0xff pattern:$0x75316420]  ;;  %v111_v55 = vpop.permute.xlu2 %110 }
  0x8a   :  { %353 = vrot.lane.b32.xlu2 %v349_v48, %s879_s19  ;;  %374 = vrot.lane.b32.xlu0 %v370_v51, %s880_s20  ;;  %v69_v56 = vsel %vm68_vm1, %v63_v53, %v65_v45  ;;  %390 = vst [vmem:[#allocation1 + $0x11] ss:$2 sm:$0xff] %v956_v29 }
  0x8b   :  { %74 = vst [vmem:[#allocation2] sm:$0xf0] %v69_v56 }
  0x8c   :  { %v67_v57 = vpop.permute.xlu0 %66  ;;  %120 = vst.msk [vmem:[#allocation2 + $0x38] sm:$0xf0] %vm76_vm2, %v111_v55 }
  0x8d   :  { %v70_v58 = vsel %vm68_vm1, %v65_v45, %v67_v57  ;;  %77 = vst.msk [vmem:[#allocation2 + $0x10] sm:$0xf0] %vm76_vm2, %v67_v57  ;;  %vm335_vm1 = vcmask 105472  }
  0x8e   :  { %v391_v59 = vld.sshfl [vmem:[#allocation1] sm:$0xff pattern:$0x75316420]  ;;  %75 = vst [vmem:[#allocation2 + $0x8] sm:$0xf0] %v70_v58 }
  0x8f   :  { %394 = vrot.lane.b32.xlu1 %v391_v59, %s881_s21  ;;  %v392_v60 = vld.sshfl [vmem:[#allocation1 + $0x8] sm:$0xff pattern:$0x75316420] }
  0x90   :  { %409 = vst [vmem:[#allocation1] ss:$2 sm:$0xff] %v951_v26 }
  0x91   :  { %v87_v61 = vpop.permute.xlu1 %86  ;;  %v393_v62 = vld.sshfl [vmem:[#allocation1 + $0x10] sm:$0xff pattern:$0x75316420]  ;;  %v132_v63 = vpop.permute.xlu2 %131 }
  0x92   :  { %376 = vrot.lane.b32.xlu0 %v371_v54, %s880_s20  ;;  %372 = vrot.lane.b32.xlu2 %v369_v52, %s880_s20  ;;  %411 = vst [vmem:[#allocation1 + $0x10] ss:$2 sm:$0xff] %v956_v29 }
  0x93   :  { %141 = vst.msk [vmem:[#allocation2 + $0x60] sm:$0xf] %vm53_vm0, %v132_v63 }
  0x94   :  { %v85_v0 = vpop.permute.xlu0 %84 }
  0x95   :  { %v91_v1 = vsel %vm90_vm3, %v85_v0, %v87_v61  ;;  %v431_v57 = vld [vmem:[#allocation2 + $0x8] sm:$0xff] }
  0x96   :  { %96 = vst [vmem:[#allocation2 + $0x28] sm:$0xf] %v91_v1 }
  0x97   :  { %398 = vrot.lane.b32.xlu1 %v393_v62, %s881_s21  ;;  %v412_v2 = vld.sshfl [vmem:[#allocation1] sm:$0xff pattern:$0x75316420]  ;;  %v413_v6 = vld.sshfl [vmem:[#allocation1 + $0x8] sm:$0xff pattern:$0x75316420] }
  0x99   :  { %v89_v3 = vpop.permute.xlu1 %88  ;;  %v150_v4 = vpop.permute.xlu2 %149  ;;  %v414_v10 = vld.sshfl [vmem:[#allocation1 + $0x10] sm:$0xff pattern:$0x75316420] }
  0x9a   :  { %396 = vrot.lane.b32.xlu2 %v392_v60, %s881_s21  ;;  %415 = vrot.lane.b32.xlu0 %v412_v2, %s882_s22  ;;  %v92_v5 = vsel %vm90_vm3, %v87_v61, %v89_v3  ;;  %98 = vst.msk [vmem:[#allocation2 + $0x38] sm:$0xf] %vm53_vm0, %v89_v3  ;;  %v883_v60 = vmov 0   ;;  %v475_v61 = vld [vmem:[%s1145_s2 + $0x10] sm:$0xff]  ;;  %v473_v2 = vld [vmem:[%s1145_s2] sm:$0xff]  ;;  %vm278_vm3 = vcmask 523268  }
  0x9b   :  { %97 = vst [vmem:[#allocation2 + $0x30] sm:$0xf] %v92_v5  ;;  %808 = vset.pattern.permute.xlu0 %v883_v60  ;;  %809 = vset.pattern.permute.xlu1 %v883_v60  ;;  %v457_v5 = vld [vmem:[#allocation3 + $0x8] sm:$0xf] }
  0x9c   :  { %v109_v7 = vpop.permute.xlu0 %108  ;;  %810 = vset.pattern.permute.xlu2 %v883_v60 }
  0x9d   :  { %v113_v8 = vsel %vm112_vm4, %v107_v50, %v109_v7  ;;  %v114_v9 = vsel %vm112_vm4, %v109_v7, %v111_v55  ;;  %v430_v55 = vld [vmem:[#allocation2] sm:$0xff]  ;;  %v496_v7 = vunpack.c.l.b16 %v457_v5  ;;  %vm378_vm4 = vcmask 1014784  }
  0x9e   :  { %118 = vst [vmem:[#allocation2 + $0x28] sm:$0xf0] %v113_v8 }
  0x9f   :  { %417 = vrot.lane.b32.xlu1 %v413_v6, %s882_s22  ;;  %119 = vst [vmem:[#allocation2 + $0x30] sm:$0xf0] %v114_v9  ;;  %v1061_v8 = vpack.c.b16 %v496_v7, %v496_v7 }
  0xa1   :  { %v128_v11 = vpop.permute.xlu1 %127  ;;  %v152_v12 = vpop.permute.xlu2 %151 }
  0xa2   :  { %243 = vrot.lane.b32.xlu2 %v961_v33, %s874_s0  ;;  %419 = vrot.lane.b32.xlu0 %v414_v10, %s882_s22  ;;  %v156_v13 = vsel %vm155_vm5, %v150_v4, %v152_v12 }
  0xa3   :  { %161 = vst [vmem:[#allocation2 + $0x50] sm:$0xf0] %v156_v13 }
  0xa5   :  { %v435_v56 = vld [vmem:[#allocation2 + $0x28] sm:$0xff] }
  0xa6   :  { %v436_v58 = vld [vmem:[#allocation2 + $0x30] sm:$0xff]  ;;  %v458_v59 = vpack.c.bf16 %v435_v56, %v430_v55 }
  0xa7   :  { %310 = vrot.lane.b32.xlu1 %v979_v40, %s877_s17  ;;  %v459_v62 = vpack.c.bf16 %v436_v58, %v431_v57 }
  0xa9   :  { %v130_v14 = vpop.permute.xlu1 %129  ;;  %v193_v15 = vpop.permute.xlu2 %192 }
  0xaa   :  { %288 = vrot.lane.b32.xlu0 %v972_v38, %s876_s16  ;;  %v134_v16 = vsel %vm133_vm6, %v128_v11, %v130_v14  ;;  %v135_v17 = vsel %vm133_vm6, %v130_v14, %v132_v63  ;;  %312 = vrot.lane.b32.xlu2 %v983_v42, %s877_s17  ;;  %v1046_v63 = vld [vmem:[#allocation3] sm:$0xff]  ;;  %vm421_vm6 = vcmask 998400  }
  0xab   :  { %139 = vst [vmem:[#allocation2 + $0x50] sm:$0xf] %v134_v16 }
  0xac   :  { %v154_v18 = vpop.permute.xlu0 %153  ;;  %140 = vst [vmem:[#allocation2 + $0x58] sm:$0xf] %v135_v17 }
  0xad   :  { %163 = vst.msk [vmem:[#allocation2 + $0x60] sm:$0xf0] %vm76_vm2, %v154_v18  ;;  %v157_v19 = vsel %vm155_vm5, %v152_v12, %v154_v18  ;;  %vm400_vm5 = vcmask 1006592  }
  0xae   :  { %162 = vst [vmem:[#allocation2 + $0x58] sm:$0xf0] %v157_v19 }
  0xaf   :  { %290 = vrot.lane.b32.xlu1 %v976_v39, %s876_s16 }
  0xb1   :  { %v173_v20 = vpop.permute.xlu1 %172  ;;  %v197_v21 = vpop.permute.xlu2 %196 }
  0xb2   :  { %267 = vrot.lane.b32.xlu0 %v967_v36, %s875_s15  ;;  %206 = vst.msk [vmem:[#allocation2 + $0x88] sm:$0xf0] %vm76_vm2, %v197_v21  ;;  %v1035_v47 = vld [vmem:[#allocation2 + $0x50] sm:$0xff]  ;;  %vm254_vm2 = vcmask 519168  }
  0xb4   :  { %v171_v22 = vpop.permute.xlu0 %170 }
  0xb5   :  { %v177_v23 = vsel %vm176_vm7, %v171_v22, %v173_v20  ;;  %v1038_v50 = vld [vmem:[#allocation2 + $0x58] sm:$0xff] }
  0xb6   :  { %182 = vst [vmem:[#allocation2 + $0x78] sm:$0xf] %v177_v23 }
  0xb7   :  { %478 = vperm.xlu1 %809, %v473_v2  }
  0xb9   :  { %v175_v24 = vpop.permute.xlu1 %174  ;;  %v1016_v25 = vpop.permute.xlu2 %265 }
  0xba   :  { %v178_v26 = vsel %vm176_vm7, %v173_v20, %v175_v24  ;;  %184 = vst.msk [vmem:[#allocation2 + $0x88] sm:$0xf] %vm53_vm0, %v175_v24  ;;  %488 = vperm.xlu0 %808, %v475_v61   ;;  %vm314_vm7 = vcmask 113664  }
  0xbb   :  { %183 = vst [vmem:[#allocation2 + $0x80] sm:$0xf] %v178_v26 }
  0xbc   :  { %v195_v27 = vpop.permute.xlu0 %194 }
  0xbd   :  { %v199_v28 = vsel %vm198_vm8, %v193_v15, %v195_v27  ;;  %v200_v29 = vsel %vm198_vm8, %v195_v27, %v197_v21  ;;  %v474_v15 = vld [vmem:[%s1145_s2 + $0x8] sm:$0xff]  ;;  %vm292_vm8 = vcmask 244736  }
  0xbe   :  { %204 = vst [vmem:[#allocation2 + $0x78] sm:$0xf0] %v199_v28  ;;  %483 = vperm.xlu2 %810, %v474_v15  }
  0xbf   :  { %205 = vst [vmem:[#allocation2 + $0x80] sm:$0xf0] %v200_v29 }
  0xc1   :  { %v1019_v30 = vpop.permute.xlu2 %286 }
  0xc2   :  { %298 = vst.msk [vmem:[#allocation2 + $0x38] sm:$0xf] %vm251_vm9, %v1019_v30 }
  0xc4   :  { %v214_v31 = vpop.permute.xlu0 %213  ;;  %v218_v32 = vpop.permute.xlu1 %217 }
  0xc5   :  { %227 = vst.msk [vmem:[#allocation2 + $0xb0] sm:$0xf] %vm53_vm0, %v218_v32  ;;  %v445_v48 = vld [vmem:[#allocation2 + $0x78] sm:$0xff]  ;;  %vm357_vm0 = vcmask 97280  }
  0xc6   :  { %v446_v51 = vld [vmem:[#allocation2 + $0x80] sm:$0xff]  ;;  %v463_v52 = vpack.c.bf16 %v445_v48, %v1035_v47 }
  0xc7   :  { %v464_v54 = vpack.c.bf16 %v446_v51, %v1038_v50 }
  0xcc   :  { %v216_v33 = vpop.permute.xlu0 %215  ;;  %v1024_v34 = vpop.permute.xlu1 %241 }
  0xcd   :  { %v220_v35 = vsel %vm219_vm10, %v214_v31, %v216_v33  ;;  %v221_v36 = vsel %vm219_vm10, %v216_v33, %v218_v32  ;;  %vm644_vm10 = vcmask 195584  }
  0xce   :  { %225 = vst [vmem:[#allocation2 + $0xa0] sm:$0xf] %v220_v35 }
  0xcf   :  { %226 = vst [vmem:[#allocation2 + $0xa8] sm:$0xf] %v221_v36 }
  0xd4   :  { %v1026_v37 = vpop.permute.xlu2 %333  ;;  %v240_v38 = vpop.permute.xlu0 %239 }
  0xd5   :  { %v450_v39 = vld [vmem:[#allocation2 + $0xa0] sm:$0xf]  ;;  %v246_v40 = vsel %vm245_vm11, %v240_v38, %v1024_v34  ;;  %252 = vst.msk [vmem:[#allocation2 + $0x10] sm:$0xf] %vm251_vm9, %v240_v38  ;;  %v264_v41 = vpop.permute.xlu1 %263 }
  0xd6   :  { %v468_v42 = vpack.c.bf16 %v450_v39, %v450_v39  ;;  %v451_v43 = vld [vmem:[#allocation2 + $0xa8] sm:$0xf]  ;;  %253 = vst [vmem:[#allocation2 + $0x18] sm:$0xf] %v246_v40  ;;  %v270_v44 = vsel %vm269_vm12, %v264_v41, %v1016_v25 }
  0xd7   :  { %v469_v45 = vpack.c.bf16 %v451_v43, %v451_v43  ;;  %276 = vst.msk [vmem:[#allocation2 + $0x10] sm:$0xf0] %vm275_vm13, %v264_v41 }
  0xd8   :  { %v508_v46 = vsel %vm506_vm14, %v468_v42, 0  ;;  %277 = vst [vmem:[#allocation2 + $0x18] sm:$0xf0] %v270_v44 }
  0xd9   :  { %527 = vmatpush.bf16.msra.mxu0 %v508_v46  ;;  %v511_v49 = vsel %vm506_vm14, %v469_v45, 0 }
  0xda   :  { %545 = vmatpush.bf16.msra.mxu1 %v511_v49 }
  0xdc   :  { %v352_v53 = vpop.permute.xlu2 %351 }
  0xdd   :  { %363 = vst.msk [vmem:[#allocation2 + $0x60] sm:$0xf0] %vm275_vm13, %v352_v53  ;;  %528 = vmatpush.bf16.msra.mxu0 %v463_v52 }
  0xde   :  { %546 = vmatpush.bf16.msra.mxu1 %v464_v54  ;;  %v432_v56 = vld [vmem:[#allocation2 + $0x10] sm:$0xff] }
  0xe1   :  { %529 = vmatpush.bf16.msra.mxu0 %v458_v59  ;;  %v1048_v0 = vpop.permute.xlu0 %308 }
  0xe2   :  { %547 = vmatpush.bf16.msra.mxu1 %v459_v62  ;;  %320 = vst.msk [vmem:[#allocation2 + $0x38] sm:$0xf0] %vm275_vm13, %v1048_v0  ;;  %v638_v62 = vld [vmem:[%s1147_s4] sm:$0xf] }
  0xe3   :  { %641 = vperm.xlu1 %809, %v638_v62  }
  0xe4   :  { %v354_v1 = vpop.permute.xlu2 %353  ;;  %770 = vmatmul.msk.bf16.vlgmr.msra.gmra.mxu0 %vm499_vm15, %v1046_v63 }
  0xe5   :  { %772 = vmatmul.msk.bf16.vlgmr.msra.gmra.mxu1 %vm499_vm15, %v1046_v63  ;;  %v358_v3 = vsel %vm357_vm0, %v352_v53, %v354_v1 }
  0xe6   :  { %364 = vst [vmem:[#allocation2 + $0x68] sm:$0xf0] %v358_v3  ;;  %v433_v3 = vld [vmem:[#allocation2 + $0x18] sm:$0xff] }
  0xe9   :  { %v330_v4 = vpop.permute.xlu1 %329  ;;  %v437_v57 = vld [vmem:[#allocation2 + $0x38] sm:$0xff] }
  0xea   :  { %341 = vst.msk [vmem:[#allocation2 + $0x60] sm:$0xf] %vm251_vm9, %v330_v4 }
  0xec   :  { %v373_v6 = vpop.permute.xlu2 %372 }
  0xf1   :  { %v332_v9 = vpop.permute.xlu1 %331  ;;  %v1089_v51 = vld [vmem:[#allocation2 + $0x60] sm:$0xff] }
  0xf2   :  { %v336_v10 = vsel %vm335_vm1, %v330_v4, %v332_v9  ;;  %v337_v11 = vsel %vm335_vm1, %v332_v9, %v1026_v37 }
  0xf3   :  { %342 = vst [vmem:[#allocation2 + $0x68] sm:$0xf] %v336_v10 }
  0xf4   :  { %v356_v12 = vpop.permute.xlu0 %355  ;;  %343 = vst.msk [vmem:[#allocation2 + $0x70] sm:$0xf] %vm254_vm2, %v337_v11  ;;  %v397_v13 = vpop.permute.xlu2 %396  ;;  %771 = vmatmul.msk.bf16.gmra.mxu0 %vm499_vm15, %v1061_v8 }
  0xf5   :  { %773 = vmatmul.msk.bf16.gmra.mxu1 %vm499_vm15, %v1061_v8  ;;  %v359_v14 = vsel %vm357_vm0, %v354_v1, %v356_v12  ;;  %v460_v1 = vpack.c.bf16 %v437_v57, %v432_v56 }
  0xf6   :  { %365 = vst.msk [vmem:[#allocation2 + $0x70] sm:$0xf0] %vm278_vm3, %v359_v14 }
  0xfa   :  { %v1097_v60 = vld [vmem:[#allocation2 + $0x68] sm:$0xff] }
  0xfc   :  { %v375_v16 = vpop.permute.xlu0 %374  ;;  %v244_v17 = vpop.permute.xlu2 %243 }
  0xfd   :  { %v379_v18 = vsel %vm378_vm4, %v373_v6, %v375_v16  ;;  %v247_v19 = vsel %vm245_vm11, %v1024_v34, %v244_v17  ;;  %v1093_v55 = vld [vmem:[#allocation2 + $0x70] sm:$0xff] }
  0xfe   :  { %384 = vst.msk [vmem:[#allocation2 + $0x88] sm:$0xf] %vm251_vm9, %v379_v18 }
  0xff   :  { %255 = vst.msk [vmem:[#allocation2 + $0x20] sm:$0xf] %vm254_vm2, %v247_v19 }
 0x101   :  { %v395_v20 = vpop.permute.xlu1 %394 }
 0x102   :  { %v401_v21 = vsel %vm400_vm5, %v395_v20, %v397_v13 }
 0x103   :  { %406 = vst.msk [vmem:[#allocation2 + $0x88] sm:$0xf0] %vm275_vm13, %v401_v21 }
 0x104   :  { %v377_v22 = vpop.permute.xlu0 %376  ;;  %v313_v33 = vpop.permute.xlu2 %312 }
 0x105   :  { %v380_v23 = vsel %vm378_vm4, %v375_v16, %v377_v22  ;;  %386 = vst.msk [vmem:[#allocation2 + $0x98] sm:$0xf] %vm254_vm2, %v377_v22 }
 0x106   :  { %385 = vst [vmem:[#allocation2 + $0x90] sm:$0xf] %v380_v23 }
 0x109   :  { %v399_v24 = vpop.permute.xlu1 %398 }
 0x10a   :  { %v402_v26 = vsel %vm400_vm5, %v397_v13, %v399_v24  ;;  %408 = vst.msk [vmem:[#allocation2 + $0x98] sm:$0xf0] %vm278_vm3, %v399_v24  ;;  %v447_v45 = vld [vmem:[#allocation2 + $0x88] sm:$0xff] }
 0x10b   :  { %407 = vst [vmem:[#allocation2 + $0x90] sm:$0xf0] %v402_v26  ;;  %v465_v53 = vpack.c.bf16 %v447_v45, %v1089_v51 }
 0x10c   :  { %v416_v27 = vpop.permute.xlu0 %415 }
 0x111   :  { %v418_v28 = vpop.permute.xlu1 %417  ;;  %v449_v49 = vld [vmem:[#allocation2 + $0x98] sm:$0xff] }
 0x112   :  { %v422_v29 = vsel %vm421_vm6, %v416_v27, %v418_v28  ;;  %v448_v54 = vld [vmem:[#allocation2 + $0x90] sm:$0xff]  ;;  %v467_v59 = vpack.c.bf16 %v449_v49, %v1093_v55 }
 0x113   :  { %427 = vst.msk [vmem:[#allocation2 + $0xb0] sm:$0xf] %vm251_vm9, %v422_v29  ;;  %v466_v61 = vpack.c.bf16 %v448_v54, %v1097_v60  ;;  %vm648_vm9 = vcmask 1043456  }
 0x114   :  { %v420_v31 = vpop.permute.xlu0 %419 }
 0x115   :  { %v423_v32 = vsel %vm421_vm6, %v418_v28, %v420_v31  ;;  %429 = vst.msk [vmem:[#allocation2 + $0xc0] sm:$0xf] %vm254_vm2, %v420_v31 }
 0x116   :  { %428 = vst [vmem:[#allocation2 + $0xb8] sm:$0xf] %v423_v32 }
 0x118   :  { %v484_v13 = vpop.permute.xlu2 %483 }
 0x119   :  { %v311_v34 = vpop.permute.xlu1 %310 }
 0x11a   :  { %v315_v35 = vsel %vm314_vm7, %v1048_v0, %v311_v34  ;;  %v452_v36 = vld [vmem:[#allocation2 + $0xb0] sm:$0xf]  ;;  %v316_v37 = vsel %vm314_vm7, %v311_v34, %v313_v33 }
 0x11b   :  { %321 = vst [vmem:[#allocation2 + $0x40] sm:$0xf0] %v315_v35  ;;  %v470_v38 = vpack.c.bf16 %v452_v36, %v452_v36 }
 0x11c   :  { %v289_v39 = vpop.permute.xlu0 %288  ;;  %v454_v40 = vld [vmem:[#allocation2 + $0xc0] sm:$0xf]  ;;  %322 = vst.msk [vmem:[#allocation2 + $0x48] sm:$0xf0] %vm278_vm3, %v316_v37 }
 0x11d   :  { %v293_v41 = vsel %vm292_vm8, %v1019_v30, %v289_v39  ;;  %v472_v42 = vpack.c.bf16 %v454_v40, %v454_v40  ;;  %v514_v43 = vsel %vm506_vm14, %v470_v38, 0  ;;  %v453_v44 = vld [vmem:[#allocation2 + $0xb8] sm:$0xf] }
 0x11e   :  { %299 = vst [vmem:[#allocation2 + $0x40] sm:$0xf] %v293_v41  ;;  %563 = vmatpush.bf16.msra.mxu2 %v514_v43  ;;  %v471_v46 = vpack.c.bf16 %v453_v44, %v453_v44  ;;  %v627_v38 = vld [vmem:[%s1146_s3] sm:$0x3]  ;;  %s884_s3 = smov [#allocation6]  }
 0x11f   :  { %v520_v48 = vsel %vm506_vm14, %v472_v42, 0  ;;  %s752_s30 = sshll.u32 %s884_s3, 4  ;;  %s753_s30 = int_to_ptr.vmem [resolvable:$true] %s752_s30 }
 0x120   :  { %599 = vmatpush.bf16.msrb.mxu0 %v520_v48  ;;  %v517_v52 = vsel %vm506_vm14, %v471_v46, 0 }
 0x121   :  { %581 = vmatpush.bf16.msra.mxu3 %v517_v52  ;;  %v291_v30 = vpop.permute.xlu1 %290 }
 0x122   :  { %v294_v58 = vsel %vm292_vm8, %v289_v39, %v291_v30  ;;  %564 = vmatpush.bf16.msra.mxu2 %v465_v53 }
 0x123   :  { %300 = vst.msk [vmem:[#allocation2 + $0x48] sm:$0xf] %vm254_vm2, %v294_v58 }
 0x124   :  { %v268_v0 = vpop.permute.xlu0 %267  ;;  %600 = vmatpush.bf16.msrb.mxu0 %v467_v59 }
 0x125   :  { %v271_v2 = vsel %vm269_vm12, %v1016_v25, %v268_v0  ;;  %582 = vmatpush.bf16.msra.mxu3 %v466_v61  ;;  %v438_v4 = vld [vmem:[#allocation2 + $0x40] sm:$0xff] }
 0x126   :  { %279 = vst.msk [vmem:[#allocation2 + $0x20] sm:$0xf0] %vm278_vm3, %v271_v2  ;;  %565 = vmatpush.bf16.msra.mxu2 %v460_v1  ;;  %v461_v5 = vpack.c.bf16 %v438_v4, %v433_v3 }
 0x129   :  { %583 = vmatpush.bf16.msra.mxu3 %v461_v5  ;;  %774 = vmatmul.msk.bf16.vlgmr.msra.gmra.mxu2 %vm499_vm15, %v1046_v63  ;;  %v479_v14 = vpop.permute.xlu1 %478 }
 0x12a   :  { %v439_v6 = vld [vmem:[#allocation2 + $0x48] sm:$0xff] }
 0x12c   :  { %776 = vmatmul.msk.bf16.vlgmr.msra.gmra.mxu3 %vm499_vm15, %v1046_v63  ;;  %v489_v15 = vpop.permute.xlu0 %488 }
 0x12d   :  { %v434_v7 = vld [vmem:[#allocation2 + $0x20] sm:$0xff] }
 0x12e   :  { %v462_v9 = vpack.c.bf16 %v439_v6, %v434_v7 }
 0x130   :  { %601 = vmatpush.bf16.msrb.mxu0 %v462_v9 }
 0x133   :  { %778 = vmatmul.msk.bf16.vlgmr.msrb.gmra.mxu0 %vm499_vm15, %v1046_v63 }
 0x139   :  { %775 = vmatmul.msk.bf16.gmra.mxu2 %vm499_vm15, %v1061_v8 }
 0x13c   :  { %777 = vmatmul.msk.bf16.gmra.mxu3 %vm499_vm15, %v1061_v8 }
 0x143   :  { %779 = vmatmul.msk.bf16.gmra.mxu0 %vm499_vm15, %v1061_v8 }
 0x161   :  { %v531_v25 = vpop.f32.mrf.mxu0 }
 0x162   :  { %v549_v10 = vpop.f32.mrf.mxu1  ;;  %v532_v17 = vadd.f32 %v531_v25, %v479_v14 }
 0x163   :  { %v550_v20 = vadd.f32 %v549_v10, %v479_v14 }
 0x164   :  { %v612_v26 = vmax.f32 %v532_v17, 0.0 }
 0x165   :  { %v613_v28 = vmax.f32 %v550_v20, 0.0 }
 0x169   :  { %v533_v11 = vpop.f32.mrf.mxu0 }
 0x16a   :  { %v551_v12 = vpop.f32.mrf.mxu1  ;;  %v534_v18 = vadd.f32 %v533_v11, %v484_v13 }
 0x16b   :  { %v552_v21 = vadd.f32 %v551_v12, %v484_v13 }
 0x16c   :  { %v617_v8 = vmax.f32 %v534_v18, 0.0 }
 0x16d   :  { %v618_v29 = vmax.f32 %v552_v21, 0.0 }
 0x16e   :  { %v628_v34 = vpack.c.bf16 %v617_v8, %v612_v26 }
 0x16f   :  { %v629_v36 = vpack.c.bf16 %v618_v29, %v613_v28 }
 0x171   :  { %v536_v16 = vpop.f32.mrf.mxu0 }
 0x172   :  { %v554_v63 = vpop.f32.mrf.mxu1  ;;  %v537_v19 = vadd.f32 %v536_v16, %v489_v15 }
 0x173   :  { %v555_v22 = vadd.f32 %v554_v63, %v489_v15 }
 0x174   :  { %v622_v23 = vmax.f32 %v537_v19, 0.0  ;;  %v642_v19 = vpop.permute.xlu1 %641 }
 0x175   :  { %v623_v24 = vmax.f32 %v555_v22, 0.0 }
 0x176   :  { %v633_v27 = vpack.c.bf16 %v622_v23, %v622_v23 }
 0x177   :  { %v634_v31 = vpack.c.bf16 %v623_v24, %v623_v24 }
 0x178   :  { %v650_v32 = vsel %vm648_vm9, %v633_v27, 0 }
 0x179   :  { %670 = vmatpush.bf16.msrb.mxu1 %v650_v32  ;;  %v653_v33 = vsel %vm648_vm9, %v634_v31, 0  ;;  %v538_v35 = vpop.f32.mrf.mxu0 }
 0x17a   :  { %683 = vmatpush.bf16.msrb.mxu2 %v653_v33  ;;  %v556_v37 = vpop.f32.mrf.mxu1 }
 0x17d   :  { %671 = vmatpush.bf16.msrb.mxu1 %v628_v34 }
 0x17e   :  { %684 = vmatpush.bf16.msrb.mxu2 %v629_v36 }
 0x180   :  { %780 = vmatmul.msk.bf16.vlgmr.msrb.gmra.mxu1 %vm644_vm10, %v627_v38 }
 0x181   :  { %781 = vmatmul.msk.bf16.vlgmr.msrb.gmra.mxu2 %vm644_vm10, %v627_v38 }
 0x1ac   :  { %v567_v39 = vpop.f32.mrf.mxu2 }
 0x1ad   :  { %v568_v53 = vadd.f32 %v567_v39, %v479_v14 }
 0x1af   :  { %v585_v40 = vpop.f32.mrf.mxu3  ;;  %v614_v3 = vmax.f32 %v568_v53, 0.0 }
 0x1b0   :  { %v603_v41 = vpop.f32.mrf.mxu0  ;;  %v586_v0 = vadd.f32 %v585_v40, %v479_v14 }
 0x1b1   :  { %v604_v4 = vadd.f32 %v603_v41, %v479_v14 }
 0x1b2   :  { %v615_v12 = vmax.f32 %v586_v0, 0.0 }
 0x1b3   :  { %v616_v16 = vmax.f32 %v604_v4, 0.0 }
 0x1b4   :  { %v569_v42 = vpop.f32.mrf.mxu2 }
 0x1b5   :  { %v570_v48 = vadd.f32 %v569_v42, %v484_v13 }
 0x1b7   :  { %v587_v43 = vpop.f32.mrf.mxu3  ;;  %v619_v59 = vmax.f32 %v570_v48, 0.0 }
 0x1b8   :  { %v605_v44 = vpop.f32.mrf.mxu0  ;;  %v588_v56 = vadd.f32 %v587_v43, %v484_v13 }
 0x1b9   :  { %v606_v61 = vadd.f32 %v605_v44, %v484_v13  ;;  %v630_v11 = vpack.c.bf16 %v619_v59, %v614_v3 }
 0x1ba   :  { %v620_v7 = vmax.f32 %v588_v56, 0.0 }
 0x1bb   :  { %v621_v25 = vmax.f32 %v606_v61, 0.0 }
 0x1bc   :  { %v572_v45 = vpop.f32.mrf.mxu2  ;;  %v631_v18 = vpack.c.bf16 %v620_v7, %v615_v12 }
 0x1bd   :  { %v573_v46 = vadd.f32 %v572_v45, %v489_v15  ;;  %v632_v14 = vpack.c.bf16 %v621_v25, %v616_v16 }
 0x1bf   :  { %v624_v49 = vmax.f32 %v573_v46, 0.0  ;;  %v590_v52 = vpop.f32.mrf.mxu3 }
 0x1c0   :  { %v591_v54 = vadd.f32 %v590_v52, %v489_v15  ;;  %v608_v30 = vpop.f32.mrf.mxu0 }
 0x1c1   :  { %v635_v57 = vpack.c.bf16 %v624_v49, %v624_v49  ;;  %v609_v58 = vadd.f32 %v608_v30, %v489_v15 }
 0x1c2   :  { %v625_v62 = vmax.f32 %v591_v54, 0.0 }
 0x1c3   :  { %v626_v1 = vmax.f32 %v609_v58, 0.0  ;;  %v656_v2 = vsel %vm648_vm9, %v635_v57, 0 }
 0x1c4   :  { %v636_v5 = vpack.c.bf16 %v625_v62, %v625_v62  ;;  %v574_v6 = vpop.f32.mrf.mxu2  ;;  %696 = vmatpush.bf16.msrb.mxu3 %v656_v2 }
 0x1c5   :  { %v637_v9 = vpack.c.bf16 %v626_v1, %v626_v1 }
 0x1c6   :  { %v659_v10 = vsel %vm648_vm9, %v636_v5, 0 }
 0x1c7   :  { %709 = vmatpush.bf16.msra.mxu1 %v659_v10  ;;  %v662_v13 = vsel %vm648_vm9, %v637_v9, 0  ;;  %v592_v15 = vpop.f32.mrf.mxu3 }
 0x1c8   :  { %722 = vmatpush.bf16.msra.mxu2 %v662_v13  ;;  %697 = vmatpush.bf16.msrb.mxu3 %v630_v11  ;;  %v610_v17 = vpop.f32.mrf.mxu0 }
 0x1cb   :  { %710 = vmatpush.bf16.msra.mxu1 %v631_v18  ;;  %782 = vmatmul.msk.bf16.vlgmr.msrb.gmra.mxu3 %vm644_vm10, %v627_v38 }
 0x1cc   :  { %723 = vmatpush.bf16.msra.mxu2 %v632_v14 }
 0x1ce   :  { %783 = vmatmul.msk.bf16.vlgmr.msra.gmra.mxu1 %vm644_vm10, %v627_v38 }
 0x1cf   :  { %784 = vmatmul.msk.bf16.vlgmr.msra.gmra.mxu2 %vm644_vm10, %v627_v38 }
 0x1fd   :  { %v673_v63 = vpop.f32.mrf.mxu1 }
 0x1fe   :  { %v674_v21 = vadd.f32 %v673_v63, %v642_v19 }
 0x200   :  { %v729_v26 = vadd.f32 %v674_v21, %v1035_v47 }
 0x204   :  { %v686_v20 = vpop.f32.mrf.mxu2 }
 0x205   :  { %v687_v22 = vadd.f32 %v686_v20, %v642_v19  ;;  %v675_v23 = vpop.f32.mrf.mxu1 }
 0x207   :  { %v730_v24 = vadd.f32 %v687_v22, %v1038_v50 }
 0x209   :  { %v738_v8 = vrot.slane %v730_v24, 4 }
 0x20b   :  { %v740_v27 = vsel %vm648_vm9, %v729_v26, %v738_v8 }
 0x20c   :  { %744 = vst [vmem:[#allocation6] sm:$0xff] %v740_v27  ;;  %v688_v28 = vpop.f32.mrf.mxu2 }
 0x24b   :  { %v712_v29 = vpop.f32.mrf.mxu1 }
 0x24c   :  { %v713_v31 = vadd.f32 %v712_v29, %v642_v19 }
 0x24e   :  { %v732_v32 = vadd.f32 %v713_v31, %v1097_v60  ;;  %v699_v33 = vpop.f32.mrf.mxu3 }
 0x24f   :  { %v700_v34 = vadd.f32 %v699_v33, %v642_v19 }
 0x250   :  { %v739_v35 = vrot.slane %v732_v32, 4 }
 0x251   :  { %v731_v36 = vadd.f32 %v700_v34, %v1089_v51 }
 0x252   :  { %v725_v37 = vpop.f32.mrf.mxu2 }
 0x253   :  { %v741_v47 = vsel %vm648_vm9, %v731_v36, %v739_v35  ;;  %v726_v50 = vadd.f32 %v725_v37, %v642_v19  ;;  %v714_v38 = vpop.f32.mrf.mxu1 }
 0x254   :  { %745 = vst [vmem:[#allocation6 + $0x8] sm:$0xff] %v741_v47 }
 0x255   :  { %v733_v39 = vadd.f32 %v726_v50, %v1093_v55 }
 0x256   :  { %v701_v60 = vpop.f32.mrf.mxu3 }
 0x257   :  { %746 = vst.msk [vmem:[#allocation6 + $0x10] sm:$0xf] %vm254_vm2, %v733_v39 }
 0x258   :  { %757 = dma.vmem_to_hbm [thread:$0]  %s753_s30, 320, %s755_s8, [#allocation5]  }
 0x25a   :  { %v727_v51 = vpop.f32.mrf.mxu2 }
 0x25b   :  { %861 = dma.done.wait [#allocation5], 320  }
 0x25c   :  { %862 = vsyncadd [#allocation5], 4294966976 }
 0x25d   :  { %762 = vsyncpa [#allocation4], 1 }
 0x25e   :  { %763 = vsyncpa [#allocation5], 1 }

</bundles_post_ra>
